<compile_context>
chip_gen: v6e
topology: v6e:2x2x1
jax: 0.10.0
libtpu: 0.0.40
codegen_flags: <defaults>
</compile_context>

<pallas_src>
import functools

import jax
import jax.numpy as jnp
from jax import lax
from jax.experimental import pallas as pl
from jax.experimental.pallas import tpu as pltpu

EPS = 1e-5  # nn.BatchNorm2d default eps


def _bn_train_rows(y, gamma, beta):
    """BatchNorm2d (training mode) in (C, pixels) layout: biased batch stats per channel."""
    mu = jnp.mean(y, axis=1, keepdims=True)
    d = y - mu
    var = jnp.mean(d * d, axis=1, keepdims=True)
    return d * lax.rsqrt(var + EPS) * gamma + beta


def resblock_kernel(n, h, w, cmid, cout,
                    x_ref,      # (N, Cin, H*W)    NCHW reshaped (no transpose)
                    w1_ref,     # (Cmid, Cin)      1x1 conv1 weight
                    w2_ref,     # (Cmid, 9*Cmid)   3x3 conv2 weight, im2col order
                    w3_ref,     # (Cout, Cmid)     1x1 conv3 weight
                    pvec_ref,   # (Cmax, 9)        packed [b1 g1 be1 b2 g2 be2 b3 g3 be3]
                    mask_ref,   # (9, N*H*W)       3x3 boundary validity masks
                    o_ref,      # (N, Cout, H*W)
                    col_ref):   # (9*Cmid, N*H*W)  im2col VMEM scratch
    hw = h * w
    npix = n * hw

    # Whole batch as one lane-dense (Cin, N*H*W) operand (aligned lane concat).
    x_all = jnp.concatenate([x_ref[i] for i in range(n)], axis=-1)

    b1, g1, be1 = pvec_ref[:cmid, 0:1], pvec_ref[:cmid, 1:2], pvec_ref[:cmid, 2:3]
    b2, g2, be2 = pvec_ref[:cmid, 3:4], pvec_ref[:cmid, 4:5], pvec_ref[:cmid, 5:6]
    b3, g3, be3 = pvec_ref[:cout, 6:7], pvec_ref[:cout, 7:8], pvec_ref[:cout, 8:9]

    # ---- conv1 (1x1) + bn1 + relu ------------------------------------------
    y1 = jnp.dot(w1_ref[...], x_all, preferred_element_type=jnp.float32) + b1
    h1 = jnp.maximum(_bn_train_rows(y1, g1, be1), 0.0)            # (Cmid, NP)

    # ---- conv2 (3x3, stride=1, pad=1): im2col -> ONE matmul with K=9*Cmid ---
    for k in range(9):
        oy, ox = k // 3 - 1, k % 3 - 1
        off = oy * w + ox
        if off == 0:
            tap = h1                                              # center tap, no mask
        else:
            shifted = pltpu.roll(h1, shift=(-off) % npix, axis=1)  # cheap lane roll
            tap = shifted * mask_ref[k:k + 1, :]                   # zero out-of-image pixels
        col_ref[k * cmid:(k + 1) * cmid, :] = tap
    y2 = jnp.dot(w2_ref[...], col_ref[...], preferred_element_type=jnp.float32) + b2
    h2 = jnp.maximum(_bn_train_rows(y2, g2, be2), 0.0)            # (Cmid, NP)

    # ---- conv3 (1x1) + bn3 + residual add + relu ---------------------------
    y3 = jnp.dot(w3_ref[...], h2, preferred_element_type=jnp.float32) + b3
    out = jnp.maximum(_bn_train_rows(y3, g3, be3) + x_all, 0.0)   # (Cout, NP)

    # Lane-dense (Cout, H*W) stores per image -> free reshape to NCHW outside.
    for i in range(n):
        o_ref[i] = out[:, i * hw:(i + 1) * hw]


def resblock_pallas(x_nchw, p):
    """x_nchw: (N, Cin, H, W) float32.  Returns (N, Cout, H, W) float32."""
    N, Cin, H, W = x_nchw.shape
    Cmid = p["w1"].shape[0]          # conv1 out_channels
    Cout = p["w3"].shape[0]          # conv3 out_channels (= Cmid * 4)
    assert Cout == Cin, "no identity_downsample => in_channels == out_channels*4"
    HW, NPIX = H * W, N * H * W

    x3d = x_nchw.reshape(N, Cin, HW)          # free reshape, no transpose

    # Conv weights in matmul-ready (out, in[*tap]) form; 1x1 weights need no
    # transpose at all, the 3x3 weights are permuted into im2col row order.
    w1 = p["w1"].reshape(Cmid, Cin)
    w2 = jnp.transpose(p["w2"], (0, 2, 3, 1)).reshape(Cmid, 9 * Cmid)
    w3 = p["w3"].reshape(Cout, Cmid)

    # Pack the 9 tiny per-channel vectors into a single (Cmax, 9) input.
    cmax = max(Cmid, Cout)

    def col(v):
        return jnp.pad(v, (0, cmax - v.shape[0])).reshape(cmax, 1)

    pvec = jnp.concatenate(
        [col(p["b1"]), col(p["g1"]), col(p["be1"]),
         col(p["b2"]), col(p["g2"]), col(p["be2"]),
         col(p["b3"]), col(p["g3"]), col(p["be3"])], axis=1)       # (Cmax, 9)

    # Precompute the 9 boundary-validity masks for the 3x3 taps (H, W static),
    # so the kernel does no integer div/mod or compares at all.
    pix = jnp.arange(NPIX, dtype=jnp.int32)
    xpix = pix % W
    ypix = (pix // W) % H
    masks = []
    for k in range(9):
        oy, ox = k // 3 - 1, k % 3 - 1
        valid = ((ypix + oy >= 0) & (ypix + oy < H) &
                 (xpix + ox >= 0) & (xpix + ox < W))
        masks.append(valid.astype(jnp.float32))
    mask = jnp.stack(masks, axis=0)                                # (9, NPIX)

    vmem = pl.BlockSpec(memory_space=pltpu.MemorySpace.VMEM)
    out3d = pl.pallas_call(
        functools.partial(resblock_kernel, N, H, W, Cmid, Cout),
        out_shape=jax.ShapeDtypeStruct((N, Cout, HW), jnp.float32),
        in_specs=[vmem] * 6,
        out_specs=vmem,
        scratch_shapes=[pltpu.VMEM((9 * Cmid, NPIX), jnp.float32)],
    )(x3d, w1, w2, w3, pvec, mask)

    # TODO(synk): for real ResNet sizes add a pixel-tiled grid (parallel axis for
    # v7x's 2 TCs, tiles sized to the 64 MiB VMEM) with a separate cross-tile
    # BatchNorm-statistics pass; at this demo size the whole block is a single
    # VMEM-resident tile, so a grid would add only per-step overhead.
    return out3d.reshape(N, Cout, H, W)


# ------------------------- pure-JAX reference -------------------------------
def resblock_ref(x_nchw, p):
    x = jnp.transpose(x_nchw, (0, 2, 3, 1))  # NHWC

    def conv(h, w_oihw, b, pad):
        w_hwio = jnp.transpose(w_oihw, (2, 3, 1, 0))
        y = lax.conv_general_dilated(h, w_hwio, (1, 1), [(pad, pad), (pad, pad)],
                                     dimension_numbers=("NHWC", "HWIO", "NHWC"))
        return y + b

    def bn(y, g, be):
        mu = jnp.mean(y, axis=(0, 1, 2), keepdims=True)
        var = jnp.mean(jnp.square(y - mu), axis=(0, 1, 2), keepdims=True)
        return (y - mu) * lax.rsqrt(var + EPS) * g + be

    h = jax.nn.relu(bn(conv(x, p["w1"], p["b1"], 0), p["g1"], p["be1"]))
    h = jax.nn.relu(bn(conv(h, p["w2"], p["b2"], 1), p["g2"], p["be2"]))
    h = bn(conv(h, p["w3"], p["b3"], 0), p["g3"], p["be3"])
    out = jax.nn.relu(h + x)
    return jnp.transpose(out, (0, 3, 1, 2))


if __name__ == "__main__":
    N, H, W = 2, 16, 16
    out_channels, expansion = 4, 4
    Cin = out_channels * expansion      # 16 (so the residual add is valid)
    Cmid = out_channels                 # 4
    Cout = out_channels * expansion     # 16

    key = jax.random.PRNGKey(0)
    ks = jax.random.split(key, 13)
    params = {
        # PyTorch nn.Conv2d weight shapes: (out, in, kh, kw); biases: (out,)
        "w1": 0.3 * jax.random.normal(ks[0], (Cmid, Cin, 1, 1), jnp.float32),
        "b1": 0.1 * jax.random.normal(ks[1], (Cmid,), jnp.float32),
        "g1": 1.0 + 0.1 * jax.random.normal(ks[2], (Cmid,), jnp.float32),
        "be1": 0.1 * jax.random.normal(ks[3], (Cmid,), jnp.float32),
        "w2": 0.3 * jax.random.normal(ks[4], (Cmid, Cmid, 3, 3), jnp.float32),
        "b2": 0.1 * jax.random.normal(ks[5], (Cmid,), jnp.float32),
        "g2": 1.0 + 0.1 * jax.random.normal(ks[6], (Cmid,), jnp.float32),
        "be2": 0.1 * jax.random.normal(ks[7], (Cmid,), jnp.float32),
        "w3": 0.3 * jax.random.normal(ks[8], (Cout, Cmid, 1, 1), jnp.float32),
        "b3": 0.1 * jax.random.normal(ks[9], (Cout,), jnp.float32),
        "g3": 1.0 + 0.1 * jax.random.normal(ks[10], (Cout,), jnp.float32),
        "be3": 0.1 * jax.random.normal(ks[11], (Cout,), jnp.float32),
    }
    x = jax.random.normal(ks[12], (N, Cin, H, W), jnp.float32)

    out = jax.jit(resblock_pallas)(x, params)
    out = jax.block_until_ready(out)

    ref = jax.block_until_ready(resblock_ref(x, params))
    err = float(jnp.max(jnp.abs(out - ref)))
    if not bool(jnp.allclose(out, ref, rtol=1e-2, atol=1e-2)):
        raise AssertionError(f"Pallas ResBlock mismatch vs reference, max|diff|={err}")

    # TODO(synk): only the stride=1 / identity_downsample=None path is implemented,
    # matching the module's default constructor arguments.
    print("KERNEL_OK")
</pallas_src>

<mosaic_0001>
module attributes {stable_mosaic.version = 11 : i64} {
  func.func @resblock_kernel(%arg0: memref<2x16x256xf32, #tpu.memory_space<vmem>>, %arg1: memref<4x16xf32, #tpu.memory_space<vmem>>, %arg2: memref<4x36xf32, #tpu.memory_space<vmem>>, %arg3: memref<16x4xf32, #tpu.memory_space<vmem>>, %arg4: memref<16x9xf32, #tpu.memory_space<vmem>>, %arg5: memref<9x512xf32, #tpu.memory_space<vmem>>, %arg6: memref<2x16x256xf32, #tpu.memory_space<vmem>>, %arg7: memref<36x512xf32, #tpu.memory_space<vmem>>) attributes {dimension_semantics = [], scalar_prefetch = 0 : i64, scratch_operands = 1 : i64, tpu.core_type = #tpu.core_type<tc>} {
    %c0 = arith.constant 0 : index
    %c0_0 = arith.constant 0 : index
    %c0_1 = arith.constant 0 : index
    %0 = vector.load %arg0[%c0, %c0_0, %c0_1] : memref<2x16x256xf32, #tpu.memory_space<vmem>>, vector<1x16x256xf32>
    %1 = vector.shape_cast %0 : vector<1x16x256xf32> to vector<16x256xf32>
    %c1 = arith.constant 1 : index
    %c0_2 = arith.constant 0 : index
    %c0_3 = arith.constant 0 : index
    %2 = vector.load %arg0[%c1, %c0_2, %c0_3] : memref<2x16x256xf32, #tpu.memory_space<vmem>>, vector<1x16x256xf32>
    %3 = vector.shape_cast %2 : vector<1x16x256xf32> to vector<16x256xf32>
    %4 = tpu.concatenate %1, %3 in 1 : vector<16x256xf32>, vector<16x256xf32> -> vector<16x512xf32>
    %c0_4 = arith.constant 0 : index
    %c0_5 = arith.constant 0 : index
    %5 = vector.load %arg4[%c0_4, %c0_5] : memref<16x9xf32, #tpu.memory_space<vmem>>, vector<4x1xf32>
    %c0_6 = arith.constant 0 : index
    %c1_7 = arith.constant 1 : index
    %6 = vector.load %arg4[%c0_6, %c1_7] : memref<16x9xf32, #tpu.memory_space<vmem>>, vector<4x1xf32>
    %c0_8 = arith.constant 0 : index
    %c2 = arith.constant 2 : index
    %7 = vector.load %arg4[%c0_8, %c2] : memref<16x9xf32, #tpu.memory_space<vmem>>, vector<4x1xf32>
    %c0_9 = arith.constant 0 : index
    %c3 = arith.constant 3 : index
    %8 = vector.load %arg4[%c0_9, %c3] : memref<16x9xf32, #tpu.memory_space<vmem>>, vector<4x1xf32>
    %c0_10 = arith.constant 0 : index
    %c4 = arith.constant 4 : index
    %9 = vector.load %arg4[%c0_10, %c4] : memref<16x9xf32, #tpu.memory_space<vmem>>, vector<4x1xf32>
    %c0_11 = arith.constant 0 : index
    %c5 = arith.constant 5 : index
    %10 = vector.load %arg4[%c0_11, %c5] : memref<16x9xf32, #tpu.memory_space<vmem>>, vector<4x1xf32>
    %c0_12 = arith.constant 0 : index
    %c6 = arith.constant 6 : index
    %11 = vector.load %arg4[%c0_12, %c6] : memref<16x9xf32, #tpu.memory_space<vmem>>, vector<16x1xf32>
    %c0_13 = arith.constant 0 : index
    %c7 = arith.constant 7 : index
    %12 = vector.load %arg4[%c0_13, %c7] : memref<16x9xf32, #tpu.memory_space<vmem>>, vector<16x1xf32>
    %c0_14 = arith.constant 0 : index
    %c8 = arith.constant 8 : index
    %13 = vector.load %arg4[%c0_14, %c8] : memref<16x9xf32, #tpu.memory_space<vmem>>, vector<16x1xf32>
    %c0_15 = arith.constant 0 : index
    %c0_16 = arith.constant 0 : index
    %14 = vector.load %arg1[%c0_15, %c0_16] : memref<4x16xf32, #tpu.memory_space<vmem>>, vector<4x16xf32>
    %cst = arith.constant dense<0.000000e+00> : vector<4x512xf32>
    %15 = tpu.matmul %14, %4, %cst {dimension_numbers = #tpu.dot_dimension_numbers<[1], [0], [0], [1], [0, 0, 1, 1], [], []>} : vector<4x16xf32>, vector<16x512xf32>, vector<4x512xf32> -> vector<4x512xf32>
    %16 = vector.broadcast %5 : vector<4x1xf32> to vector<4x512xf32>
    %17 = arith.addf %15, %16 : vector<4x512xf32>
    %cst_17 = arith.constant dense<0.000000e+00> : vector<4xf32>
    %18 = vector.multi_reduction <add>, %17, %cst_17 [1] : vector<4x512xf32> to vector<4xf32>
    %19 = vector.shape_cast %18 : vector<4xf32> to vector<4x1xf32>
    %cst_18 = arith.constant 5.120000e+02 : f32
    %20 = vector.broadcast %cst_18 : f32 to vector<4x1xf32>
    %21 = arith.divf %19, %20 : vector<4x1xf32>
    %22 = vector.broadcast %21 : vector<4x1xf32> to vector<4x512xf32>
    %23 = arith.subf %17, %22 : vector<4x512xf32>
    %24 = arith.mulf %23, %23 : vector<4x512xf32>
    %cst_19 = arith.constant dense<0.000000e+00> : vector<4xf32>
    %25 = vector.multi_reduction <add>, %24, %cst_19 [1] : vector<4x512xf32> to vector<4xf32>
    %26 = vector.shape_cast %25 : vector<4xf32> to vector<4x1xf32>
    %cst_20 = arith.constant 5.120000e+02 : f32
    %27 = vector.broadcast %cst_20 : f32 to vector<4x1xf32>
    %28 = arith.divf %26, %27 : vector<4x1xf32>
    %cst_21 = arith.constant 9.99999974E-6 : f32
    %29 = vector.broadcast %cst_21 : f32 to vector<4x1xf32>
    %30 = arith.addf %28, %29 : vector<4x1xf32>
    %31 = math.rsqrt %30 : vector<4x1xf32>
    %32 = vector.broadcast %31 : vector<4x1xf32> to vector<4x512xf32>
    %33 = arith.mulf %23, %32 : vector<4x512xf32>
    %34 = vector.broadcast %6 : vector<4x1xf32> to vector<4x512xf32>
    %35 = arith.mulf %33, %34 : vector<4x512xf32>
    %36 = vector.broadcast %7 : vector<4x1xf32> to vector<4x512xf32>
    %37 = arith.addf %35, %36 : vector<4x512xf32>
    %cst_22 = arith.constant 0.000000e+00 : f32
    %38 = vector.broadcast %cst_22 : f32 to vector<4x512xf32>
    %39 = arith.maximumf %37, %38 : vector<4x512xf32>
    %c17_i32 = arith.constant 17 : i32
    %40 = tpu.dynamic_rotate %39 by %c17_i32 dim 1 : vector<4x512xf32>, i32 -> vector<4x512xf32>
    %c0_23 = arith.constant 0 : index
    %c0_24 = arith.constant 0 : index
    %41 = vector.load %arg5[%c0_23, %c0_24] : memref<9x512xf32, #tpu.memory_space<vmem>>, vector<1x512xf32>
    %42 = vector.broadcast %41 : vector<1x512xf32> to vector<4x512xf32>
    %43 = arith.mulf %40, %42 : vector<4x512xf32>
    %c0_25 = arith.constant 0 : index
    %c0_26 = arith.constant 0 : index
    %44 = vector.load %arg7[%c0_25, %c0_26] : memref<36x512xf32, #tpu.memory_space<vmem>>, vector<4x512xf32>
    tpu.vector_store %arg7[%c0_25, %c0_26], %43 {strides = array<i32>} : memref<36x512xf32, #tpu.memory_space<vmem>>, vector<4x512xf32>,
    %c16_i32 = arith.constant 16 : i32
    %45 = tpu.dynamic_rotate %39 by %c16_i32 dim 1 : vector<4x512xf32>, i32 -> vector<4x512xf32>
    %c1_27 = arith.constant 1 : index
    %c0_28 = arith.constant 0 : index
    %46 = vector.load %arg5[%c1_27, %c0_28] : memref<9x512xf32, #tpu.memory_space<vmem>>, vector<1x512xf32>
    %47 = vector.broadcast %46 : vector<1x512xf32> to vector<4x512xf32>
    %48 = arith.mulf %45, %47 : vector<4x512xf32>
    %c4_29 = arith.constant 4 : index
    %c0_30 = arith.constant 0 : index
    %49 = vector.load %arg7[%c4_29, %c0_30] : memref<36x512xf32, #tpu.memory_space<vmem>>, vector<4x512xf32>
    tpu.vector_store %arg7[%c4_29, %c0_30], %48 {strides = array<i32>} : memref<36x512xf32, #tpu.memory_space<vmem>>, vector<4x512xf32>,
    %c15_i32 = arith.constant 15 : i32
    %50 = tpu.dynamic_rotate %39 by %c15_i32 dim 1 : vector<4x512xf32>, i32 -> vector<4x512xf32>
    %c2_31 = arith.constant 2 : index
    %c0_32 = arith.constant 0 : index
    %51 = vector.load %arg5[%c2_31, %c0_32] : memref<9x512xf32, #tpu.memory_space<vmem>>, vector<1x512xf32>
    %52 = vector.broadcast %51 : vector<1x512xf32> to vector<4x512xf32>
    %53 = arith.mulf %50, %52 : vector<4x512xf32>
    %c8_33 = arith.constant 8 : index
    %c0_34 = arith.constant 0 : index
    %54 = vector.load %arg7[%c8_33, %c0_34] : memref<36x512xf32, #tpu.memory_space<vmem>>, vector<4x512xf32>
    tpu.vector_store %arg7[%c8_33, %c0_34], %53 {strides = array<i32>} : memref<36x512xf32, #tpu.memory_space<vmem>>, vector<4x512xf32>,
    %c1_i32 = arith.constant 1 : i32
    %55 = tpu.dynamic_rotate %39 by %c1_i32 dim 1 : vector<4x512xf32>, i32 -> vector<4x512xf32>
    %c3_35 = arith.constant 3 : index
    %c0_36 = arith.constant 0 : index
    %56 = vector.load %arg5[%c3_35, %c0_36] : memref<9x512xf32, #tpu.memory_space<vmem>>, vector<1x512xf32>
    %57 = vector.broadcast %56 : vector<1x512xf32> to vector<4x512xf32>
    %58 = arith.mulf %55, %57 : vector<4x512xf32>
    %c12 = arith.constant 12 : index
    %c0_37 = arith.constant 0 : index
    %59 = vector.load %arg7[%c12, %c0_37] : memref<36x512xf32, #tpu.memory_space<vmem>>, vector<4x512xf32>
    tpu.vector_store %arg7[%c12, %c0_37], %58 {strides = array<i32>} : memref<36x512xf32, #tpu.memory_space<vmem>>, vector<4x512xf32>,
    %c16 = arith.constant 16 : index
    %c0_38 = arith.constant 0 : index
    %60 = vector.load %arg7[%c16, %c0_38] : memref<36x512xf32, #tpu.memory_space<vmem>>, vector<4x512xf32>
    tpu.vector_store %arg7[%c16, %c0_38], %39 {strides = array<i32>} : memref<36x512xf32, #tpu.memory_space<vmem>>, vector<4x512xf32>,
    %c511_i32 = arith.constant 511 : i32
    %61 = tpu.dynamic_rotate %39 by %c511_i32 dim 1 : vector<4x512xf32>, i32 -> vector<4x512xf32>
    %c5_39 = arith.constant 5 : index
    %c0_40 = arith.constant 0 : index
    %62 = vector.load %arg5[%c5_39, %c0_40] : memref<9x512xf32, #tpu.memory_space<vmem>>, vector<1x512xf32>
    %63 = vector.broadcast %62 : vector<1x512xf32> to vector<4x512xf32>
    %64 = arith.mulf %61, %63 : vector<4x512xf32>
    %c20 = arith.constant 20 : index
    %c0_41 = arith.constant 0 : index
    %65 = vector.load %arg7[%c20, %c0_41] : memref<36x512xf32, #tpu.memory_space<vmem>>, vector<4x512xf32>
    tpu.vector_store %arg7[%c20, %c0_41], %64 {strides = array<i32>} : memref<36x512xf32, #tpu.memory_space<vmem>>, vector<4x512xf32>,
    %c497_i32 = arith.constant 497 : i32
    %66 = tpu.dynamic_rotate %39 by %c497_i32 dim 1 : vector<4x512xf32>, i32 -> vector<4x512xf32>
    %c6_42 = arith.constant 6 : index
    %c0_43 = arith.constant 0 : index
    %67 = vector.load %arg5[%c6_42, %c0_43] : memref<9x512xf32, #tpu.memory_space<vmem>>, vector<1x512xf32>
    %68 = vector.broadcast %67 : vector<1x512xf32> to vector<4x512xf32>
    %69 = arith.mulf %66, %68 : vector<4x512xf32>
    %c24 = arith.constant 24 : index
    %c0_44 = arith.constant 0 : index
    %70 = vector.load %arg7[%c24, %c0_44] : memref<36x512xf32, #tpu.memory_space<vmem>>, vector<4x512xf32>
    tpu.vector_store %arg7[%c24, %c0_44], %69 {strides = array<i32>} : memref<36x512xf32, #tpu.memory_space<vmem>>, vector<4x512xf32>,
    %c496_i32 = arith.constant 496 : i32
    %71 = tpu.dynamic_rotate %39 by %c496_i32 dim 1 : vector<4x512xf32>, i32 -> vector<4x512xf32>
    %c7_45 = arith.constant 7 : index
    %c0_46 = arith.constant 0 : index
    %72 = vector.load %arg5[%c7_45, %c0_46] : memref<9x512xf32, #tpu.memory_space<vmem>>, vector<1x512xf32>
    %73 = vector.broadcast %72 : vector<1x512xf32> to vector<4x512xf32>
    %74 = arith.mulf %71, %73 : vector<4x512xf32>
    %c28 = arith.constant 28 : index
    %c0_47 = arith.constant 0 : index
    %75 = vector.load %arg7[%c28, %c0_47] : memref<36x512xf32, #tpu.memory_space<vmem>>, vector<4x512xf32>
    tpu.vector_store %arg7[%c28, %c0_47], %74 {strides = array<i32>} : memref<36x512xf32, #tpu.memory_space<vmem>>, vector<4x512xf32>,
    %c495_i32 = arith.constant 495 : i32
    %76 = tpu.dynamic_rotate %39 by %c495_i32 dim 1 : vector<4x512xf32>, i32 -> vector<4x512xf32>
    %c8_48 = arith.constant 8 : index
    %c0_49 = arith.constant 0 : index
    %77 = vector.load %arg5[%c8_48, %c0_49] : memref<9x512xf32, #tpu.memory_space<vmem>>, vector<1x512xf32>
    %78 = vector.broadcast %77 : vector<1x512xf32> to vector<4x512xf32>
    %79 = arith.mulf %76, %78 : vector<4x512xf32>
    %c32 = arith.constant 32 : index
    %c0_50 = arith.constant 0 : index
    %80 = vector.load %arg7[%c32, %c0_50] : memref<36x512xf32, #tpu.memory_space<vmem>>, vector<4x512xf32>
    tpu.vector_store %arg7[%c32, %c0_50], %79 {strides = array<i32>} : memref<36x512xf32, #tpu.memory_space<vmem>>, vector<4x512xf32>,
    %c0_51 = arith.constant 0 : index
    %c0_52 = arith.constant 0 : index
    %81 = vector.load %arg2[%c0_51, %c0_52] : memref<4x36xf32, #tpu.memory_space<vmem>>, vector<4x36xf32>
    %c0_53 = arith.constant 0 : index
    %c0_54 = arith.constant 0 : index
    %82 = vector.load %arg7[%c0_53, %c0_54] : memref<36x512xf32, #tpu.memory_space<vmem>>, vector<36x512xf32>
    %cst_55 = arith.constant dense<0.000000e+00> : vector<4x512xf32>
    %83 = tpu.matmul %81, %82, %cst_55 {dimension_numbers = #tpu.dot_dimension_numbers<[1], [0], [0], [1], [0, 0, 1, 1], [], []>} : vector<4x36xf32>, vector<36x512xf32>, vector<4x512xf32> -> vector<4x512xf32>
    %84 = vector.broadcast %8 : vector<4x1xf32> to vector<4x512xf32>
    %85 = arith.addf %83, %84 : vector<4x512xf32>
    %cst_56 = arith.constant dense<0.000000e+00> : vector<4xf32>
    %86 = vector.multi_reduction <add>, %85, %cst_56 [1] : vector<4x512xf32> to vector<4xf32>
    %87 = vector.shape_cast %86 : vector<4xf32> to vector<4x1xf32>
    %cst_57 = arith.constant 5.120000e+02 : f32
    %88 = vector.broadcast %cst_57 : f32 to vector<4x1xf32>
    %89 = arith.divf %87, %88 : vector<4x1xf32>
    %90 = vector.broadcast %89 : vector<4x1xf32> to vector<4x512xf32>
    %91 = arith.subf %85, %90 : vector<4x512xf32>
    %92 = arith.mulf %91, %91 : vector<4x512xf32>
    %cst_58 = arith.constant dense<0.000000e+00> : vector<4xf32>
    %93 = vector.multi_reduction <add>, %92, %cst_58 [1] : vector<4x512xf32> to vector<4xf32>
    %94 = vector.shape_cast %93 : vector<4xf32> to vector<4x1xf32>
    %cst_59 = arith.constant 5.120000e+02 : f32
    %95 = vector.broadcast %cst_59 : f32 to vector<4x1xf32>
    %96 = arith.divf %94, %95 : vector<4x1xf32>
    %cst_60 = arith.constant 9.99999974E-6 : f32
    %97 = vector.broadcast %cst_60 : f32 to vector<4x1xf32>
    %98 = arith.addf %96, %97 : vector<4x1xf32>
    %99 = math.rsqrt %98 : vector<4x1xf32>
    %100 = vector.broadcast %99 : vector<4x1xf32> to vector<4x512xf32>
    %101 = arith.mulf %91, %100 : vector<4x512xf32>
    %102 = vector.broadcast %9 : vector<4x1xf32> to vector<4x512xf32>
    %103 = arith.mulf %101, %102 : vector<4x512xf32>
    %104 = vector.broadcast %10 : vector<4x1xf32> to vector<4x512xf32>
    %105 = arith.addf %103, %104 : vector<4x512xf32>
    %cst_61 = arith.constant 0.000000e+00 : f32
    %106 = vector.broadcast %cst_61 : f32 to vector<4x512xf32>
    %107 = arith.maximumf %105, %106 : vector<4x512xf32>
    %c0_62 = arith.constant 0 : index
    %c0_63 = arith.constant 0 : index
    %108 = vector.load %arg3[%c0_62, %c0_63] : memref<16x4xf32, #tpu.memory_space<vmem>>, vector<16x4xf32>
    %cst_64 = arith.constant dense<0.000000e+00> : vector<16x512xf32>
    %109 = tpu.matmul %108, %107, %cst_64 {dimension_numbers = #tpu.dot_dimension_numbers<[1], [0], [0], [1], [0, 0, 1, 1], [], []>} : vector<16x4xf32>, vector<4x512xf32>, vector<16x512xf32> -> vector<16x512xf32>
    %110 = vector.broadcast %11 : vector<16x1xf32> to vector<16x512xf32>
    %111 = arith.addf %109, %110 : vector<16x512xf32>
    %cst_65 = arith.constant dense<0.000000e+00> : vector<16xf32>
    %112 = vector.multi_reduction <add>, %111, %cst_65 [1] : vector<16x512xf32> to vector<16xf32>
    %113 = vector.shape_cast %112 : vector<16xf32> to vector<16x1xf32>
    %cst_66 = arith.constant 5.120000e+02 : f32
    %114 = vector.broadcast %cst_66 : f32 to vector<16x1xf32>
    %115 = arith.divf %113, %114 : vector<16x1xf32>
    %116 = vector.broadcast %115 : vector<16x1xf32> to vector<16x512xf32>
    %117 = arith.subf %111, %116 : vector<16x512xf32>
    %118 = arith.mulf %117, %117 : vector<16x512xf32>
    %cst_67 = arith.constant dense<0.000000e+00> : vector<16xf32>
    %119 = vector.multi_reduction <add>, %118, %cst_67 [1] : vector<16x512xf32> to vector<16xf32>
    %120 = vector.shape_cast %119 : vector<16xf32> to vector<16x1xf32>
    %cst_68 = arith.constant 5.120000e+02 : f32
    %121 = vector.broadcast %cst_68 : f32 to vector<16x1xf32>
    %122 = arith.divf %120, %121 : vector<16x1xf32>
    %cst_69 = arith.constant 9.99999974E-6 : f32
    %123 = vector.broadcast %cst_69 : f32 to vector<16x1xf32>
    %124 = arith.addf %122, %123 : vector<16x1xf32>
    %125 = math.rsqrt %124 : vector<16x1xf32>
    %126 = vector.broadcast %125 : vector<16x1xf32> to vector<16x512xf32>
    %127 = arith.mulf %117, %126 : vector<16x512xf32>
    %128 = vector.broadcast %12 : vector<16x1xf32> to vector<16x512xf32>
    %129 = arith.mulf %127, %128 : vector<16x512xf32>
    %130 = vector.broadcast %13 : vector<16x1xf32> to vector<16x512xf32>
    %131 = arith.addf %129, %130 : vector<16x512xf32>
    %132 = arith.addf %131, %4 : vector<16x512xf32>
    %cst_70 = arith.constant 0.000000e+00 : f32
    %133 = vector.broadcast %cst_70 : f32 to vector<16x512xf32>
    %134 = arith.maximumf %132, %133 : vector<16x512xf32>
    %135 = vector.extract_strided_slice %134 {offsets = [0, 0], sizes = [16, 256], strides = [1, 1]} : vector<16x512xf32> to vector<16x256xf32>
    %c0_71 = arith.constant 0 : index
    %c0_72 = arith.constant 0 : index
    %c0_73 = arith.constant 0 : index
    %136 = vector.load %arg6[%c0_71, %c0_72, %c0_73] : memref<2x16x256xf32, #tpu.memory_space<vmem>>, vector<1x16x256xf32>
    %137 = vector.shape_cast %136 : vector<1x16x256xf32> to vector<16x256xf32>
    %138 = vector.shape_cast %135 : vector<16x256xf32> to vector<1x16x256xf32>
    tpu.vector_store %arg6[%c0_71, %c0_72, %c0_73], %138 {strides = array<i32>} : memref<2x16x256xf32, #tpu.memory_space<vmem>>, vector<1x16x256xf32>,
    %139 = vector.extract_strided_slice %134 {offsets = [0, 256], sizes = [16, 256], strides = [1, 1]} : vector<16x512xf32> to vector<16x256xf32>
    %c1_74 = arith.constant 1 : index
    %c0_75 = arith.constant 0 : index
    %c0_76 = arith.constant 0 : index
    %140 = vector.load %arg6[%c1_74, %c0_75, %c0_76] : memref<2x16x256xf32, #tpu.memory_space<vmem>>, vector<1x16x256xf32>
    %141 = vector.shape_cast %140 : vector<1x16x256xf32> to vector<16x256xf32>
    %142 = vector.shape_cast %139 : vector<16x256xf32> to vector<1x16x256xf32>
    tpu.vector_store %arg6[%c1_74, %c0_75, %c0_76], %142 {strides = array<i32>} : memref<2x16x256xf32, #tpu.memory_space<vmem>>, vector<1x16x256xf32>,
    return
  }
}

</mosaic_0001>

<bundles_post_ra>
// kernel: resblock_pallas.1
= control target key start
LH: loop header
LB: loop body
LE: loop exit
PB: predicated region body
PF: predicated region fallthrough
CT: control target
= control target key end

     0   :  { %v1259_v3 = vmov 0.0   ;;  %vm41_vm0 = vcmask 130048   ;;  %v1260_v11 = vmov 0   ;;  %v1261_v12 = vmov 1   ;;  %s1264_s17 = smov 112   ;;  %s1265_s18 = smov 113   ;;  %s1663_s0 = inlined_call_operand.vmem [shape: f32[2,16,256], index: 0, kind: input, shape index: {}]   ;;  %s1664_s1 = inlined_call_operand.vmem [shape: f32[4,16], index: 1, kind: input, shape index: {}]   ;;  %s1665_s4 = inlined_call_operand.vmem [shape: f32[16,9], index: 4, kind: input, shape index: {}]   ;;  %s1666_s5 = inlined_call_operand.vmem [shape: f32[9,512], index: 5, kind: input, shape index: {}]   ;;  %s1667_s2 = inlined_call_operand.vmem [shape: f32[4,36], index: 2, kind: input, shape index: {}]   ;;  %s1668_s3 = inlined_call_operand.vmem [shape: f32[16,4], index: 3, kind: input, shape index: {}]   ;;  %s1669_s6 = inlined_call_operand.vmem [shape: f32[2,16,256], index: 6, kind: output, shape index: {}]  }
   0x1   :  { %v26_v0 = vld [vmem:[%s1663_s0 + $0x18] sm:$0xff]  ;;  %v25_v2 = vld [vmem:[%s1663_s0 + $0x10] sm:$0xff]  ;;  %109 = vmatprep.mubr.f32.mxu0 %v1259_v3  ;;  %180 = vmatprep.mubr.f32.mxu1 %v1259_v3  ;;  %v24_v5 = vld [vmem:[%s1663_s0 + $0x8] sm:$0xff]  ;;  %v1262_v13 = vmov 2   ;;  %vm187_vm1 = vcmask 1043456   ;;  %s1266_s19 = smov 1  }
   0x2   :  { %v1186_v1 = vld [vmem:[%s1663_s0 + $0x38] sm:$0xff]  ;;  %73 = vmatprep.subr.mxu0 %v26_v0  ;;  %v1185_v4 = vld [vmem:[%s1663_s0 + $0x30] sm:$0xff]  ;;  %v1184_v6 = vld [vmem:[%s1663_s0 + $0x28] sm:$0xff]  ;;  %1232 = vset.pattern.permute.xlu0 %v1260_v11  ;;  %s1267_s20 = smov 16   ;;  %s1268_s21 = smov 127   ;;  %vm673_vm10 = vcmask 293888  }
   0x3   :  { %144 = vmatprep.subr.mxu1 %v1186_v1  ;;  %74 = vmatpush1.msra.mxu0 %v25_v2  ;;  %v23_v7 = vld [vmem:[%s1663_s0] sm:$0xff]  ;;  %s1269_s22 = smov 15   ;;  %s1270_s23 = smov 17   ;;  %vm897_vm11 = vcmask 31744  }
   0x4   :  { %145 = vmatpush1.msra.mxu1 %v1185_v4  ;;  %v1183_v8 = vld [vmem:[%s1663_s0 + $0x20] sm:$0xff]  ;;  %75 = vmatprep.subr.mxu0 %v24_v5 }
   0x5   :  { %v35_v9 = vld [vmem:[%s1664_s1] sm:$0xf]  ;;  %146 = vmatprep.subr.mxu1 %v1184_v6  ;;  %76 = vmatpush1.msra.mxu0 %v23_v7  ;;  %s1263_s1 = smov 111   ;;  %v1271_v6 = vmov 3   ;;  %v251_v7 = vlaneseq }
   0x6   :  { %147 = vmatpush1.msra.mxu1 %v1183_v8  ;;  %v1344_v10 = vld [vmem:[%s1665_s4] sm:$0xf]  ;;  %1187 = vmatmul.mubr.msk.f32.vlgmr.msra.gmra.mxu0 %vm41_vm0, %v35_v9 }
   0x7   :  { %1188 = vmatmul.mubr.msk.f32.vlgmr.msra.gmra.mxu1 %vm41_vm0, %v35_v9  ;;  %753 = vmatprep.mubr.f32.mxu0 %v1259_v3  ;;  %v261_v8 = vshrl.u32 %v251_v7, 7  ;;  %v1368_v9 = vand.u32 127, %v251_v7 }
   0x8   :  { %38 = vperm.xlu0 %1232, %v1344_v10   ;;  %824 = vmatprep.mubr.f32.mxu1 %v1259_v3 }
   0x9   :  { %1233 = vset.pattern.permute.xlu1 %v1261_v12  ;;  %v1370_v11 = vsub.s32 1, %v261_v8  ;;  %v1375_v12 = vld [vmem:[%s1666_s5 + $0x7] ss:$8 sm:$0xf]  ;;  %vm556_vm2 = vcmp.lt.s32.totalorder %v1368_v9, 112  ;;  %vm612_vm3 = vcmp.lt.s32.totalorder %v1368_v9, 111 }
   0xa   :  { %224 = vperm.xlu1 %1233, %v1344_v10   ;;  %vm456_vm4 = vcmp.lt.s32.totalorder %v1368_v9, 127  ;;  %vm512_vm5 = vcmp.lt.s32.totalorder %v1368_v9, 113  ;;  %vm296_vm6 = vcmp.lt.s32.totalorder %v1368_v9, 16  ;;  %vm396_vm7 = vcmp.lt.s32.totalorder %v1368_v9, 1 }
   0xb   :  { %vm352_vm8 = vcmp.lt.s32.totalorder %v1368_v9, 15  ;;  %vm253_vm9 = vcmp.lt.s32.totalorder %v1368_v9, 17 }
   0xe   :  { %1234 = vset.pattern.permute.xlu1 %v1262_v13 }
   0xf   :  { %232 = vperm.xlu1 %1234, %v1344_v10  }
  0x13   :  { %1235 = vset.pattern.permute.xlu1 %v1271_v6 }
  0x83   :  { %v39_v14 = vpop.permute.xlu0 %38 }
  0x85   :  { %v225_v47 = vpop.permute.xlu1 %224 }
  0x8a   :  { %v233_v48 = vpop.permute.xlu1 %232 }
  0xc6   :  { %v111_v15 = vpop.f32.mrf.mxu0 }
  0xc7   :  { %v182_v16 = vpop.f32.mrf.mxu1  ;;  %v112_v17 = vadd.f32 %v111_v15, %v39_v14  ;;  %v571_v15 = vrot.slane %v1375_v12, %v1370_v11 }
  0xc8   :  { %v113_v18 = vpop.f32.mrf.mxu0  ;;  %v183_v20 = vadd.f32 %v182_v16, %v39_v14  ;;  %v1195_v16 = vld [vmem:[%s1666_s5 + $0x20] ss:$8 sm:$0xf] }
  0xc9   :  { %v184_v19 = vpop.f32.mrf.mxu1  ;;  %v114_v21 = vadd.f32 %v113_v18, %v39_v14  ;;  %v188_v22 = vsel %vm187_vm1, %v112_v17, 0.0 }
  0xca   :  { %v185_v24 = vadd.f32 %v184_v19, %v39_v14  ;;  %v191_v26 = vsel %vm187_vm1, %v183_v20, 0.0 }
  0xcb   :  { %v189_v23 = vsel %vm187_vm1, %v114_v21, 0.0 }
  0xcc   :  { %v190_v25 = vadd.f32 %v189_v23, %v188_v22  ;;  %v193_v28 = vsel %vm187_vm1, %v185_v24, 0.0  ;;  %v1392_v22 = vsub.s32 0, %v261_v8 }
  0xce   :  { %v192_v27 = vadd.f32 %v191_v26, %v190_v25 }
  0xd0   :  { %v194_v29 = vadd.f32 %v193_v28, %v192_v27  ;;  %v567_v28 = vrot.slane %v1375_v12, %v1392_v22 }
  0xd2   :  { %195 = vadd.xlane.f32.xlu0 %v194_v29  ;;  %v1400_v29 = vsub.s32 2, %v261_v8 }
 0x15b   :  { %v196_v30 = vpop.xlane.xlu0 %195 }
 0x15c   :  { %v198_v31 = vmul.f32 0.001953125, %v196_v30  ;;  %v1402_v30 = vsub.s32 3, %v261_v8 }
 0x15e   :  { %v199_v32 = vsub.f32 %v112_v17, %v198_v31  ;;  %v200_v33 = vsub.f32 %v114_v21, %v198_v31  ;;  %v201_v34 = vsub.f32 %v183_v20, %v198_v31  ;;  %v202_v35 = vsub.f32 %v185_v24, %v198_v31 }
 0x15f   :  { %v627_v21 = vrot.slane %v1195_v16, %v1370_v11 }
 0x160   :  { %v203_v36 = vmul.f32 %v199_v32, %v199_v32  ;;  %v204_v37 = vmul.f32 %v200_v33, %v200_v33  ;;  %v205_v38 = vmul.f32 %v201_v34, %v201_v34  ;;  %v206_v39 = vmul.f32 %v202_v35, %v202_v35 }
 0x162   :  { %v207_v40 = vsel %vm187_vm1, %v203_v36, 0.0  ;;  %v208_v41 = vsel %vm187_vm1, %v204_v37, 0.0  ;;  %v210_v43 = vsel %vm187_vm1, %v205_v38, 0.0  ;;  %v212_v45 = vsel %vm187_vm1, %v206_v39, 0.0 }
 0x163   :  { %v209_v42 = vadd.f32 %v208_v41, %v207_v40  ;;  %v623_v36 = vrot.slane %v1195_v16, %v1392_v22  ;;  %v635_v37 = vrot.slane %v1195_v16, %v1402_v30 }
 0x165   :  { %v211_v44 = vadd.f32 %v210_v43, %v209_v42 }
 0x167   :  { %v213_v46 = vadd.f32 %v212_v45, %v211_v44 }
 0x169   :  { %214 = vadd.xlane.f32.xlu1 %v213_v46 }
 0x1f2   :  { %v215_v49 = vpop.xlane.xlu1 %214 }
 0x1f3   :  { %v216_v50 = vmul.f32 0.001953125, %v215_v49 }
 0x1f5   :  { %v217_v51 = vadd.f32 1e-05, %v216_v50 }
 0x1f7   :  { %1243 = vrsqrt.f32 %v217_v51 }
 0x204   :  { %v1244_v52 = vpop.eup %1243 }
 0x205   :  { %v221_v53 = vmul.f32 %v1244_v52, %v201_v34  ;;  %v220_v54 = vmul.f32 %v1244_v52, %v200_v33  ;;  %v219_v55 = vmul.f32 %v1244_v52, %v199_v32  ;;  %v222_v56 = vmul.f32 %v1244_v52, %v202_v35  ;;  %v1431_v52 = vld [vmem:[%s1666_s5 + $0x6] ss:$8 sm:$0xf] }
 0x206   :  { %v631_v35 = vrot.slane %v1195_v16, %v1400_v29 }
 0x207   :  { %v229_v57 = vmul.f32 %v225_v47, %v221_v53  ;;  %v228_v58 = vmul.f32 %v225_v47, %v220_v54  ;;  %v227_v59 = vmul.f32 %v225_v47, %v219_v55  ;;  %v230_v60 = vmul.f32 %v225_v47, %v222_v56 }
 0x209   :  { %v237_v61 = vadd.f32 %v233_v48, %v229_v57  ;;  %v236_v62 = vadd.f32 %v233_v48, %v228_v58  ;;  %v235_v63 = vadd.f32 %v233_v48, %v227_v59  ;;  %v238_v0 = vadd.f32 %v233_v48, %v230_v60  ;;  %v1192_v48 = vld [vmem:[%s1666_s5 + $0x5] ss:$8 sm:$0xf]  ;;  %v1441_v57 = vld [vmem:[%s1666_s5 + $0x1] ss:$8 sm:$0xf] }
 0x20a   :  { %v471_v51 = vrot.slane %v1192_v48, %v1370_v11  ;;  %v475_v56 = vrot.slane %v1192_v48, %v1400_v29  ;;  %v523_v59 = vrot.slane %v1431_v52, %v1392_v22  ;;  %v527_v60 = vrot.slane %v1431_v52, %v1370_v11 }
 0x20b   :  { %v241_v1 = vmax.f32 %v237_v61, 0.0  ;;  %v240_v2 = vmax.f32 %v236_v62, 0.0  ;;  %v239_v4 = vmax.f32 %v235_v63, 0.0  ;;  %v242_v5 = vmax.f32 %v238_v0, 0.0 }
 0x20c   :  { %v467_v8 = vrot.slane %v1192_v48, %v1392_v22  ;;  %v479_v16 = vrot.slane %v1192_v48, %v1402_v30 }
 0x20d   :  { %608 = vrot.lane.b32.xlu0 %v241_v1, %s1263_s1  ;;  %446 = vst [vmem:[#allocation2 + $0x28] sm:$0xf] %v241_v1  ;;  %550 = vrot.lane.b32.xlu1 %v240_v2, %s1264_s17  ;;  %445 = vst [vmem:[#allocation2 + $0x88] sm:$0xf] %v240_v2 }
 0x20e   :  { %444 = vst [vmem:[#allocation2 + $0x8] sm:$0xf] %v239_v4  ;;  %447 = vst [vmem:[#allocation2 + $0x40] sm:$0xf] %v242_v5 }
 0x211   :  { %508 = vrot.lane.b32.xlu0 %v241_v1, %s1265_s18  ;;  %552 = vrot.lane.b32.xlu1 %v241_v1, %s1264_s17 }
 0x215   :  { %606 = vrot.lane.b32.xlu1 %v240_v2, %s1263_s1  ;;  %504 = vrot.lane.b32.xlu0 %v239_v4, %s1265_s18 }
 0x219   :  { %390 = vrot.lane.b32.xlu0 %v240_v2, %s1266_s19  ;;  %548 = vrot.lane.b32.xlu1 %v239_v4, %s1264_s17 }
 0x21d   :  { %610 = vrot.lane.b32.xlu0 %v242_v5, %s1263_s1  ;;  %604 = vrot.lane.b32.xlu1 %v239_v4, %s1263_s1 }
 0x221   :  { %288 = vrot.lane.b32.xlu0 %v239_v4, %s1267_s20  ;;  %450 = vrot.lane.b32.xlu1 %v240_v2, %s1268_s21 }
 0x225   :  { %344 = vrot.lane.b32.xlu0 %v239_v4, %s1269_s22  ;;  %452 = vrot.lane.b32.xlu1 %v241_v1, %s1268_s21 }
 0x229   :  { %454 = vrot.lane.b32.xlu0 %v242_v5, %s1268_s21  ;;  %506 = vrot.lane.b32.xlu1 %v240_v2, %s1265_s18 }
 0x22d   :  { %294 = vrot.lane.b32.xlu0 %v242_v5, %s1267_s20  ;;  %448 = vrot.lane.b32.xlu1 %v239_v4, %s1268_s21 }
 0x231   :  { %243 = vrot.lane.b32.xlu0 %v239_v4, %s1270_s23  ;;  %388 = vrot.lane.b32.xlu1 %v239_v4, %s1266_s19  ;;  %v307_v4 = vrot.slane %v1441_v57, %v1392_v22 }
 0x235   :  { %392 = vrot.lane.b32.xlu0 %v241_v1, %s1266_s19  ;;  %554 = vrot.lane.b32.xlu1 %v242_v5, %s1264_s17 }
 0x239   :  { %292 = vrot.lane.b32.xlu0 %v241_v1, %s1267_s20  ;;  %394 = vrot.lane.b32.xlu1 %v242_v5, %s1266_s19 }
 0x23d   :  { %247 = vrot.lane.b32.xlu0 %v241_v1, %s1270_s23  ;;  %290 = vrot.lane.b32.xlu1 %v240_v2, %s1267_s20 }
 0x241   :  { %346 = vrot.lane.b32.xlu1 %v240_v2, %s1269_s22 }
 0x245   :  { %510 = vrot.lane.b32.xlu1 %v242_v5, %s1265_s18 }
 0x249   :  { %350 = vrot.lane.b32.xlu1 %v242_v5, %s1269_s22 }
 0x24d   :  { %245 = vrot.lane.b32.xlu1 %v240_v2, %s1270_s23 }
 0x251   :  { %249 = vrot.lane.b32.xlu1 %v242_v5, %s1270_s23 }
 0x255   :  { %348 = vrot.lane.b32.xlu1 %v241_v1, %s1269_s22 }
 0x259   :  { %670 = vperm.xlu1 %1235, %v1344_v10  }
 0x27f   :  { %v609_v13 = vpop.permute.xlu0 %608  ;;  %v551_v14 = vpop.permute.xlu1 %550 }
 0x283   :  { %v1383_v17 = vpop.permute.xlu0 %508  ;;  %v1385_v18 = vpop.permute.xlu1 %552 }
 0x284   :  { %v558_v19 = vsel %vm556_vm2, %v551_v14, %v1385_v18 }
 0x285   :  { %v585_v20 = vmul.f32 %v571_v15, %v558_v19  ;;  %v1467_v19 = vld [vmem:[%s1666_s5 + $0x3] ss:$8 sm:$0xf] }
 0x287   :  { %v593_v23 = vrot.slane %v585_v20, 4  ;;  %v607_v24 = vpop.permute.xlu1 %606  ;;  %v1394_v25 = vpop.permute.xlu0 %504 }
 0x288   :  { %v614_v26 = vsel %vm612_vm3, %v607_v24, %v609_v13 }
 0x289   :  { %601 = vst [vmem:[#allocation2 + $0x10] sm:$0xf0] %v593_v23  ;;  %v641_v27 = vmul.f32 %v627_v21, %v614_v26 }
 0x28b   :  { %645 = vst [vmem:[#allocation2 + $0x48] sm:$0xf] %v641_v27  ;;  %v1404_v31 = vpop.permute.xlu0 %390  ;;  %v1406_v32 = vpop.permute.xlu1 %548 }
 0x28c   :  { %v559_v33 = vsel %vm556_vm2, %v1406_v32, %v551_v14 }
 0x28d   :  { %v584_v34 = vmul.f32 %v567_v28, %v559_v33 }
 0x28f   :  { %v592_v38 = vrot.slane %v584_v34, 4  ;;  %v611_v39 = vpop.permute.xlu0 %610  ;;  %v605_v40 = vpop.permute.xlu1 %604 }
 0x290   :  { %v613_v41 = vsel %vm612_vm3, %v609_v13, %v611_v39  ;;  %v615_v42 = vsel %vm612_vm3, %v605_v40, %v607_v24  ;;  %v616_v43 = vsel %vm612_vm3, %v611_v39, %v605_v40 }
 0x291   :  { %600 = vst [vmem:[#allocation2 + $0x58] sm:$0xf0] %v592_v38  ;;  %v642_v44 = vmul.f32 %v631_v35, %v613_v41  ;;  %v640_v45 = vmul.f32 %v623_v36, %v615_v42  ;;  %v643_v46 = vmul.f32 %v635_v37, %v616_v43  ;;  %v411_v35 = vrot.slane %v1467_v19, %v1370_v11 }
 0x292   :  { %v666_v47 = vld [vmem:[#allocation2 + $0x48] sm:$0xf]  ;;  %v415_v43 = vrot.slane %v1467_v19, %v1400_v29 }
 0x293   :  { %646 = vst [vmem:[#allocation2 + $0x70] sm:$0xf] %v642_v44  ;;  %644 = vst [vmem:[#allocation2 + $0x20] sm:$0xf] %v640_v45  ;;  %1196 = vmatprep.subr.msk.mxu0 %vm187_vm1, %v666_v47  ;;  %v1424_v49 = vpop.permute.xlu0 %288  ;;  %v451_v50 = vpop.permute.xlu1 %450  ;;  %v575_v44 = vrot.slane %v1375_v12, %v1400_v29  ;;  %v579_v45 = vrot.slane %v1375_v12, %v1402_v30 }
 0x294   :  { %647 = vst [vmem:[#allocation2 + $0x90] sm:$0xf] %v643_v46 }
 0x297   :  { %v1433_v53 = vpop.permute.xlu0 %344  ;;  %v453_v54 = vpop.permute.xlu1 %452 }
 0x298   :  { %v458_v55 = vsel %vm456_vm4, %v451_v50, %v453_v54 }
 0x299   :  { %v485_v58 = vmul.f32 %v471_v51, %v458_v55 }
 0x29a   :  { %v665_v61 = vld [vmem:[#allocation2 + $0x20] sm:$0xf]  ;;  %v667_v63 = vld [vmem:[#allocation2 + $0x70] sm:$0xf] }
 0x29b   :  { %v668_v62 = vld [vmem:[#allocation2 + $0x90] sm:$0xf]  ;;  %v493_v0 = vrot.slane %v485_v58, 4  ;;  %v455_v1 = vpop.permute.xlu0 %454  ;;  %1197 = vmatpush1.msk.msra.mxu0 %vm187_vm1, %v665_v61  ;;  %v507_v2 = vpop.permute.xlu1 %506 }
 0x29c   :  { %1199 = vmatprep.subr.msk.mxu1 %vm187_vm1, %v668_v62  ;;  %v457_v5 = vsel %vm456_vm4, %v453_v54, %v455_v1  ;;  %v514_v6 = vsel %vm512_vm5, %v507_v2, %v1383_v17  ;;  %v515_v7 = vsel %vm512_vm5, %v1394_v25, %v507_v2  ;;  %v319_v54 = vrot.slane %v1441_v57, %v1402_v30 }
 0x29d   :  { %1200 = vmatpush1.msk.msra.mxu1 %vm187_vm1, %v667_v63  ;;  %501 = vst [vmem:[#allocation2 + $0x88] sm:$0xf0] %v493_v0  ;;  %v486_v13 = vmul.f32 %v475_v56, %v457_v5  ;;  %v540_v14 = vmul.f32 %v523_v59, %v515_v7  ;;  %v541_v15 = vmul.f32 %v527_v60, %v514_v6 }
 0x29e   :  { %v407_v59 = vrot.slane %v1467_v19, %v1392_v22  ;;  %v311_v7 = vrot.slane %v1441_v57, %v1370_v11 }
 0x29f   :  { %v494_v20 = vrot.slane %v486_v13, 4  ;;  %544 = vst [vmem:[#allocation2 + $0x58] sm:$0xf] %v540_v14  ;;  %545 = vst [vmem:[#allocation2 + $0x10] sm:$0xf] %v541_v15  ;;  %v295_v21 = vpop.permute.xlu0 %294  ;;  %v449_v23 = vpop.permute.xlu1 %448  ;;  %v315_v15 = vrot.slane %v1441_v57, %v1400_v29 }
 0x2a0   :  { %v300_v24 = vsel %vm296_vm6, %v295_v21, %v1424_v49  ;;  %v459_v26 = vsel %vm456_vm4, %v449_v23, %v451_v50  ;;  %v460_v27 = vsel %vm456_vm4, %v455_v1, %v449_v23 }
 0x2a1   :  { %502 = vst [vmem:[#allocation2 + $0x28] sm:$0xf0] %v494_v20  ;;  %v324_v28 = vmul.f32 %v307_v4, %v300_v24  ;;  %v484_v33 = vmul.f32 %v467_v8, %v459_v26  ;;  %v487_v34 = vmul.f32 %v479_v16, %v460_v27  ;;  %v1518_v16 = vld [vmem:[%s1666_s5 + $0x2] ss:$8 sm:$0xf] }
 0x2a3   :  { %v332_v36 = vrot.slane %v324_v28, 4  ;;  %v492_v37 = vrot.slane %v484_v33, 4  ;;  %v495_v38 = vrot.slane %v487_v34, 4  ;;  %v1479_v39 = vpop.permute.xlu0 %243  ;;  %v389_v40 = vpop.permute.xlu1 %388  ;;  %v367_v28 = vrot.slane %v1518_v16, %v1370_v11 }
 0x2a4   :  { %v399_v41 = vsel %vm396_vm7, %v389_v40, %v1404_v31  ;;  %v658_v58 = vld [vmem:[#allocation2 + $0x88] sm:$0xff] }
 0x2a5   :  { %340 = vst [vmem:[#allocation2] sm:$0xf0] %v332_v36  ;;  %500 = vst [vmem:[#allocation2 + $0x8] sm:$0xf0] %v492_v37  ;;  %v425_v42 = vmul.f32 %v411_v35, %v399_v41  ;;  %v531_v37 = vrot.slane %v1431_v52, %v1400_v29 }
 0x2a6   :  { %503 = vst [vmem:[#allocation2 + $0x40] sm:$0xf0] %v495_v38  ;;  %v662_v46 = vld [vmem:[#allocation2 + $0x10] sm:$0xff]  ;;  %v661_v47 = vld [vmem:[#allocation2 + $0x58] sm:$0xff]  ;;  %v535_v38 = vrot.slane %v1431_v52, %v1402_v30 }
 0x2a7   :  { %v433_v48 = vrot.slane %v425_v42, 4  ;;  %v393_v50 = vpop.permute.xlu0 %392  ;;  %713 = vmatprep.subr.mxu0 %v662_v46  ;;  %v555_v51 = vpop.permute.xlu1 %554  ;;  %v258_v46 = vld [vmem:[%s1666_s5] ss:$8 sm:$0xf] }
 0x2a8   :  { %v398_v55 = vsel %vm396_vm7, %v1404_v31, %v393_v50  ;;  %v557_v56 = vsel %vm556_vm2, %v1385_v18, %v555_v51  ;;  %v560_v12 = vsel %vm556_vm2, %v555_v51, %v1406_v32  ;;  %714 = vmatpush1.msra.mxu0 %v661_v47  ;;  %v419_v31 = vrot.slane %v1467_v19, %v1402_v30 }
 0x2a9   :  { %441 = vst [vmem:[#allocation2 + $0x68] sm:$0xf0] %v433_v48  ;;  %v426_v60 = vmul.f32 %v415_v43, %v398_v55  ;;  %v586_v61 = vmul.f32 %v575_v44, %v557_v56  ;;  %v587_v62 = vmul.f32 %v579_v45, %v560_v12  ;;  %715 = vmatprep.subr.mxu0 %v658_v58 }
 0x2aa   :  { %v363_v45 = vrot.slane %v1518_v16, %v1392_v22  ;;  %v271_v48 = vrot.slane %v258_v46, %v1400_v29  ;;  %v263_v58 = vrot.slane %v258_v46, %v1392_v22  ;;  %v659_v22 = vld [vmem:[#allocation2 + $0x28] sm:$0xff] }
 0x2ab   :  { %v434_v63 = vrot.slane %v426_v60, 4  ;;  %v594_v0 = vrot.slane %v586_v61, 4  ;;  %v595_v18 = vrot.slane %v587_v62, 4  ;;  %v293_v1 = vpop.permute.xlu0 %292  ;;  %v395_v2 = vpop.permute.xlu1 %394 }
 0x2ac   :  { %v297_v32 = vsel %vm296_vm6, %v293_v1, %v295_v21  ;;  %v397_v4 = vsel %vm396_vm7, %v393_v50, %v395_v2  ;;  %v400_v5 = vsel %vm396_vm7, %v395_v2, %v389_v40  ;;  %v657_v6 = vld [vmem:[#allocation2 + $0x8] sm:$0xff]  ;;  %v375_v2 = vrot.slane %v1518_v16, %v1402_v30 }
 0x2ad   :  { %442 = vst [vmem:[#allocation2 + $0x78] sm:$0xf0] %v434_v63  ;;  %602 = vst [vmem:[#allocation2 + $0x98] sm:$0xf0] %v594_v0  ;;  %v327_v8 = vmul.f32 %v319_v54, %v297_v32  ;;  %v424_v13 = vmul.f32 %v407_v59, %v400_v5  ;;  %v427_v14 = vmul.f32 %v419_v31, %v397_v4  ;;  %716 = vmatpush1.msra.mxu0 %v657_v6  ;;  %v660_v63 = vld [vmem:[#allocation2 + $0x40] sm:$0xff] }
 0x2ae   :  { %603 = vst [vmem:[#allocation2 + $0x60] sm:$0xf0] %v595_v18 }
 0x2af   :  { %v335_v19 = vrot.slane %v327_v8, 4  ;;  %v432_v20 = vrot.slane %v424_v13, 4  ;;  %v435_v21 = vrot.slane %v427_v14, 4  ;;  %v291_v23 = vpop.permute.xlu1 %290  ;;  %v248_v51 = vpop.permute.xlu0 %247 }
 0x2b0   :  { %v298_v24 = vsel %vm296_vm6, %v291_v23, %v293_v1  ;;  %v299_v26 = vsel %vm296_vm6, %v1424_v49, %v291_v23  ;;  %v371_v1 = vrot.slane %v1518_v16, %v1400_v29  ;;  %v648_v29 = vld [vmem:[%s1667_s2] sm:$0xf] }
 0x2b1   :  { %343 = vst [vmem:[#allocation2 + $0x18] sm:$0xf0] %v335_v19  ;;  %440 = vst [vmem:[#allocation2 + $0x30] sm:$0xf0] %v432_v20  ;;  %v325_v57 = vmul.f32 %v311_v7, %v299_v26  ;;  %v326_v27 = vmul.f32 %v315_v15, %v298_v24 }
 0x2b2   :  { %443 = vst [vmem:[#allocation2 + $0x80] sm:$0xf0] %v435_v21 }
 0x2b3   :  { %v333_v33 = vrot.slane %v325_v57, 4  ;;  %v334_v34 = vrot.slane %v326_v27, 4  ;;  %v347_v35 = vpop.permute.xlu1 %346 }
 0x2b4   :  { %v355_v36 = vsel %vm352_vm8, %v1433_v53, %v347_v35 }
 0x2b5   :  { %341 = vst [vmem:[#allocation2 + $0x38] sm:$0xf0] %v333_v33  ;;  %342 = vst [vmem:[#allocation2 + $0x50] sm:$0xf0] %v334_v34  ;;  %v381_v49 = vmul.f32 %v367_v28, %v355_v36 }
 0x2b7   :  { %385 = vst [vmem:[#allocation2 + $0x68] sm:$0xf] %v381_v49  ;;  %v511_v40 = vpop.permute.xlu1 %510 }
 0x2b8   :  { %v513_v41 = vsel %vm512_vm5, %v1383_v17, %v511_v40  ;;  %v516_v42 = vsel %vm512_vm5, %v511_v40, %v1394_v25  ;;  %v267_v25 = vrot.slane %v258_v46, %v1370_v11  ;;  %v275_v11 = vrot.slane %v258_v46, %v1402_v30 }
 0x2b9   :  { %v542_v43 = vmul.f32 %v531_v37, %v513_v41  ;;  %v543_v44 = vmul.f32 %v535_v38, %v516_v42  ;;  %v1272_v38 = vmov 4   ;;  %v1273_v40 = vmov 5  }
 0x2ba   :  { %1236 = vset.pattern.permute.xlu0 %v1272_v38  ;;  %1237 = vset.pattern.permute.xlu1 %v1273_v40 }
 0x2bb   :  { %546 = vst [vmem:[#allocation2 + $0x98] sm:$0xf] %v542_v43  ;;  %547 = vst [vmem:[#allocation2 + $0x60] sm:$0xf] %v543_v44  ;;  %v351_v52 = vpop.permute.xlu1 %350 }
 0x2bc   :  { %v356_v17 = vsel %vm352_vm8, %v351_v52, %v1433_v53 }
 0x2bd   :  { %v380_v47 = vmul.f32 %v363_v45, %v356_v17 }
 0x2be   :  { %v654_v50 = vld [vmem:[#allocation2 + $0x68] sm:$0xff] }
 0x2bf   :  { %384 = vst [vmem:[#allocation2 + $0x30] sm:$0xf] %v380_v47  ;;  %v246_v54 = vpop.permute.xlu1 %245  ;;  %717 = vmatprep.subr.mxu0 %v654_v50 }
 0x2c0   :  { %v255_v55 = vsel %vm253_vm9, %v246_v54, %v248_v51  ;;  %v256_v56 = vsel %vm253_vm9, %v1479_v39, %v246_v54 }
 0x2c1   :  { %v281_v53 = vmul.f32 %v267_v25, %v256_v56  ;;  %v282_v12 = vmul.f32 %v271_v48, %v255_v55 }
 0x2c2   :  { %v664_v59 = vld [vmem:[#allocation2 + $0x60] sm:$0xff]  ;;  %v663_v60 = vld [vmem:[#allocation2 + $0x98] sm:$0xff] }
 0x2c3   :  { %285 = vst [vmem:[#allocation2 + $0x38] sm:$0xf] %v281_v53  ;;  %286 = vst [vmem:[#allocation2 + $0x50] sm:$0xf] %v282_v12  ;;  %784 = vmatprep.subr.mxu1 %v664_v59  ;;  %v250_v61 = vpop.permute.xlu1 %249  ;;  %v1590_v12 = vld [vmem:[%s1665_s4] sm:$0xff] }
 0x2c4   :  { %v254_v62 = vsel %vm253_vm9, %v248_v51, %v250_v61  ;;  %v257_v31 = vsel %vm253_vm9, %v250_v61, %v1479_v39  ;;  %785 = vmatpush1.msra.mxu1 %v663_v60 }
 0x2c5   :  { %v280_v0 = vmul.f32 %v263_v58, %v257_v31  ;;  %v283_v18 = vmul.f32 %v275_v11, %v254_v62  ;;  %786 = vmatprep.subr.mxu1 %v660_v63  ;;  %v1274_v58 = vmov 6   ;;  %v1596_v11 = vld [vmem:[%s1665_s4 + $0x8] sm:$0xff] }
 0x2c6   :  { %787 = vmatpush1.msra.mxu1 %v659_v22  ;;  %v653_v32 = vld [vmem:[#allocation2 + $0x30] sm:$0xff] }
 0x2c7   :  { %284 = vst [vmem:[#allocation2] sm:$0xf] %v280_v0  ;;  %287 = vst [vmem:[#allocation2 + $0x18] sm:$0xf] %v283_v18  ;;  %v349_v4 = vpop.permute.xlu1 %348  ;;  %718 = vmatpush1.msra.mxu0 %v653_v32 }
 0x2c8   :  { %v353_v39 = vsel %vm352_vm8, %v349_v4, %v351_v52  ;;  %v354_v5 = vsel %vm352_vm8, %v347_v35, %v349_v4 }
 0x2c9   :  { %v382_v6 = vmul.f32 %v371_v1, %v354_v5  ;;  %v383_v7 = vmul.f32 %v375_v2, %v353_v39 }
 0x2ca   :  { %v650_v8 = vld [vmem:[#allocation2 + $0x38] sm:$0xff]  ;;  %v651_v15 = vld [vmem:[#allocation2 + $0x50] sm:$0xff] }
 0x2cb   :  { %386 = vst [vmem:[#allocation2 + $0x78] sm:$0xf] %v382_v6  ;;  %387 = vst [vmem:[#allocation2 + $0x80] sm:$0xf] %v383_v7  ;;  %719 = vmatprep.subr.mxu0 %v650_v8 }
 0x2ce   :  { %v649_v30 = vld [vmem:[#allocation2] sm:$0xff]  ;;  %v652_v9 = vld [vmem:[#allocation2 + $0x18] sm:$0xff] }
 0x2cf   :  { %720 = vmatpush1.msra.mxu0 %v649_v30 }
 0x2d0   :  { %1198 = vmatmul.mubr.msk.f32.vlgmr.msra.gmra.mxu0 %vm673_vm10, %v648_v29 }
 0x2d1   :  { %980 = vmatprep.mubr.f32.mxu0 %v1259_v3 }
 0x2d2   :  { %v656_v13 = vld [vmem:[#allocation2 + $0x80] sm:$0xff]  ;;  %v655_v14 = vld [vmem:[#allocation2 + $0x78] sm:$0xff] }
 0x2d3   :  { %788 = vmatprep.subr.mxu1 %v656_v13 }
 0x2d4   :  { %789 = vmatpush1.msra.mxu1 %v655_v14  ;;  %v671_v16 = vpop.permute.xlu1 %670  ;;  %v885_v14 = vld [vmem:[%s1668_s3] sm:$0xff] }
 0x2d5   :  { %790 = vmatprep.subr.mxu1 %v652_v9  ;;  %v886_v9 = vld [vmem:[%s1668_s3 + $0x8] sm:$0xff] }
 0x2d6   :  { %791 = vmatpush1.msra.mxu1 %v651_v15  ;;  %v1275_v15 = vmov 7  }
 0x2d7   :  { %1201 = vmatmul.mubr.msk.f32.vlgmr.msra.gmra.mxu1 %vm673_vm10, %v648_v29 }
 0x2d8   :  { %1057 = vmatprep.mubr.f32.mxu1 %v1259_v3 }
 0x390   :  { %v755_v19 = vpop.f32.mrf.mxu0 }
 0x391   :  { %v756_v20 = vadd.f32 %v755_v19, %v671_v16 }
 0x392   :  { %v757_v21 = vpop.f32.mrf.mxu0 }
 0x393   :  { %v758_v23 = vadd.f32 %v757_v21, %v671_v16  ;;  %v831_v24 = vsel %vm187_vm1, %v756_v20, 0.0 }
 0x395   :  { %v832_v26 = vsel %vm187_vm1, %v758_v23, 0.0 }
 0x396   :  { %v833_v28 = vadd.f32 %v832_v26, %v831_v24 }
 0x397   :  { %v826_v57 = vpop.f32.mrf.mxu1 }
 0x398   :  { %v827_v27 = vadd.f32 %v826_v57, %v671_v16 }
 0x399   :  { %v828_v33 = vpop.f32.mrf.mxu1 }
 0x39a   :  { %v834_v34 = vsel %vm187_vm1, %v827_v27, 0.0  ;;  %v829_v35 = vadd.f32 %v828_v33, %v671_v16 }
 0x39b   :  { %v835_v36 = vadd.f32 %v834_v34, %v833_v28 }
 0x39c   :  { %v836_v49 = vsel %vm187_vm1, %v829_v35, 0.0 }
 0x39d   :  { %v837_v37 = vadd.f32 %v836_v49, %v835_v36 }
 0x39f   :  { %838 = vadd.xlane.f32.xlu0 %v837_v37 }
 0x3b5   :  { %866 = vperm.xlu0 %1236, %v1344_v10  }
 0x3b9   :  { %1240 = vset.pattern.permute.xlu0 %v1275_v15 }
 0x428   :  { %v839_v41 = vpop.xlane.xlu0 %838 }
 0x429   :  { %v840_v42 = vmul.f32 0.001953125, %v839_v41 }
 0x42b   :  { %v841_v43 = vsub.f32 %v756_v20, %v840_v42  ;;  %v842_v44 = vsub.f32 %v758_v23, %v840_v42  ;;  %v843_v45 = vsub.f32 %v827_v27, %v840_v42  ;;  %v844_v46 = vsub.f32 %v829_v35, %v840_v42 }
 0x42d   :  { %v845_v52 = vmul.f32 %v841_v43, %v841_v43  ;;  %v846_v17 = vmul.f32 %v842_v44, %v842_v44  ;;  %v847_v47 = vmul.f32 %v843_v45, %v843_v45  ;;  %v848_v25 = vmul.f32 %v844_v46, %v844_v46 }
 0x42f   :  { %v849_v48 = vsel %vm187_vm1, %v845_v52, 0.0  ;;  %v850_v50 = vsel %vm187_vm1, %v846_v17, 0.0  ;;  %v852_v54 = vsel %vm187_vm1, %v847_v47, 0.0  ;;  %v854_v56 = vsel %vm187_vm1, %v848_v25, 0.0 }
 0x430   :  { %v851_v51 = vadd.f32 %v850_v50, %v849_v48  ;;  %v867_v62 = vpop.permute.xlu0 %866 }
 0x432   :  { %v853_v55 = vadd.f32 %v852_v54, %v851_v51 }
 0x434   :  { %v855_v53 = vadd.f32 %v854_v56, %v853_v55 }
 0x436   :  { %856 = vadd.xlane.f32.xlu1 %v855_v53 }
 0x447   :  { %874 = vperm.xlu1 %1237, %v1344_v10  }
 0x44b   :  { %1238 = vset.pattern.permute.xlu1 %v1274_v58 }
 0x44c   :  { %889 = vperm.xlu1 %1238, %v1590_v12  }
 0x450   :  { %894 = vperm.xlu1 %1238, %v1596_v11  }
 0x454   :  { %1239 = vset.pattern.permute.xlu1 %v1275_v15 }
 0x4bf   :  { %v857_v59 = vpop.xlane.xlu1 %856 }
 0x4c0   :  { %v858_v60 = vmul.f32 0.001953125, %v857_v59 }
 0x4c2   :  { %v859_v61 = vadd.f32 1e-05, %v858_v60 }
 0x4c3   :  { %v875_v22 = vpop.permute.xlu1 %874 }
 0x4c4   :  { %1245 = vrsqrt.f32 %v859_v61 }
 0x4c7   :  { %v890_v16 = vpop.permute.xlu1 %889 }
 0x4cb   :  { %v895_v33 = vpop.permute.xlu1 %894 }
 0x4d1   :  { %v1246_v10 = vpop.eup %1245 }
 0x4d2   :  { %v861_v31 = vmul.f32 %v1246_v10, %v841_v43  ;;  %v862_v63 = vmul.f32 %v1246_v10, %v842_v44  ;;  %v863_v0 = vmul.f32 %v1246_v10, %v843_v45  ;;  %v864_v18 = vmul.f32 %v1246_v10, %v844_v46 }
 0x4d3   :  { %v1276_v46 = vmov 8  }
 0x4d4   :  { %v869_v1 = vmul.f32 %v867_v62, %v861_v31  ;;  %v870_v2 = vmul.f32 %v867_v62, %v862_v63  ;;  %v871_v32 = vmul.f32 %v867_v62, %v863_v0  ;;  %v872_v4 = vmul.f32 %v867_v62, %v864_v18 }
 0x4d6   :  { %v877_v39 = vadd.f32 %v875_v22, %v869_v1  ;;  %v878_v5 = vadd.f32 %v875_v22, %v870_v2  ;;  %v879_v6 = vadd.f32 %v875_v22, %v871_v32  ;;  %v880_v7 = vadd.f32 %v875_v22, %v872_v4 }
 0x4d8   :  { %v881_v8 = vmax.f32 %v877_v39, 0.0  ;;  %v882_v29 = vmax.f32 %v878_v5, 0.0  ;;  %v883_v30 = vmax.f32 %v879_v6, 0.0  ;;  %v884_v13 = vmax.f32 %v880_v7, 0.0 }
 0x4da   :  { %1202 = vmatprep.subr.msk.mxu0 %vm187_vm1, %v882_v29  ;;  %1206 = vmatprep.subr.msk.mxu1 %vm187_vm1, %v884_v13 }
 0x4db   :  { %1203 = vmatpush1.msk.msra.mxu0 %vm187_vm1, %v881_v8  ;;  %1207 = vmatpush1.msk.msra.mxu1 %vm187_vm1, %v883_v30 }
 0x4dc   :  { %1204 = vmatmul.mubr.msk.f32.vlgmr.msra.gmra.mxu0 %vm897_vm11, %v885_v14  ;;  %1208 = vmatmul.mubr.msk.f32.vlgmr.msra.gmra.mxu1 %vm897_vm11, %v885_v14 }
 0x4dd   :  { %986 = vmatprep.mubr.f32.mxu0 %v1259_v3  ;;  %1063 = vmatprep.mubr.f32.mxu1 %v1259_v3 }
 0x4e0   :  { %1205 = vmatmul.mubr.msk.f32.gmra.mxu0 %vm897_vm11, %v886_v9  ;;  %1209 = vmatmul.mubr.msk.f32.gmra.mxu1 %vm897_vm11, %v886_v9 }
 0x59c   :  { %v982_v19 = vpop.f32.mrf.mxu0  ;;  %v1059_v20 = vpop.f32.mrf.mxu1 }
 0x59d   :  { %v983_v24 = vadd.f32 %v982_v19, %v890_v16  ;;  %v1060_v3 = vadd.f32 %v1059_v20, %v890_v16 }
 0x59e   :  { %v984_v21 = vpop.f32.mrf.mxu0  ;;  %v1061_v23 = vpop.f32.mrf.mxu1 }
 0x59f   :  { %v985_v26 = vadd.f32 %v984_v21, %v890_v16  ;;  %v1062_v35 = vadd.f32 %v1061_v23, %v890_v16 }
 0x5a0   :  { %v988_v57 = vpop.f32.mrf.mxu0  ;;  %v1065_v27 = vpop.f32.mrf.mxu1 }
 0x5a1   :  { %v1070_v28 = vadd.f32 %v985_v26, %v983_v24  ;;  %v989_v36 = vadd.f32 %v988_v57, %v895_v33  ;;  %v1066_v42 = vadd.f32 %v1065_v27, %v895_v33 }
 0x5a2   :  { %v990_v34 = vpop.f32.mrf.mxu0  ;;  %v1067_v38 = vpop.f32.mrf.mxu1 }
 0x5a3   :  { %v991_v49 = vadd.f32 %v990_v34, %v895_v33  ;;  %v1071_v37 = vadd.f32 %v1070_v28, %v1060_v3  ;;  %v1068_v43 = vadd.f32 %v1067_v38, %v895_v33 }
 0x5a5   :  { %v1075_v40 = vadd.f32 %v991_v49, %v989_v36  ;;  %v1072_v41 = vadd.f32 %v1071_v37, %v1062_v35 }
 0x5a7   :  { %1073 = vadd.xlane.f32.xlu1 %v1072_v41  ;;  %v1076_v44 = vadd.f32 %v1075_v40, %v1066_v42  ;;  %v1251_v41 = vld [vmem:[%s1663_s0] sm:$0xff] }
 0x5a9   :  { %v1077_v45 = vadd.f32 %v1076_v44, %v1068_v43 }
 0x5ab   :  { %1078 = vadd.xlane.f32.xlu0 %v1077_v45  ;;  %v1253_v45 = vld [vmem:[%s1663_s0 + $0x20] sm:$0xff] }
 0x5b8   :  { %1123 = vperm.xlu1 %1239, %v1590_v12  }
 0x5bc   :  { %1241 = vset.pattern.permute.xlu1 %v1276_v46 }
 0x5bd   :  { %1139 = vperm.xlu1 %1241, %v1590_v12  }
 0x5c1   :  { %1127 = vperm.xlu0 %1240, %v1596_v11  }
 0x5c5   :  { %1242 = vset.pattern.permute.xlu0 %v1276_v46 }
 0x630   :  { %v1074_v52 = vpop.xlane.xlu1 %1073 }
 0x631   :  { %v1080_v17 = vmul.f32 0.001953125, %v1074_v52  ;;  %v1254_v52 = vld [vmem:[%s1663_s0 + $0x28] sm:$0xff] }
 0x633   :  { %v1082_v47 = vsub.f32 %v983_v24, %v1080_v17  ;;  %v1083_v25 = vsub.f32 %v985_v26, %v1080_v17  ;;  %v1084_v48 = vsub.f32 %v1060_v3, %v1080_v17  ;;  %v1085_v51 = vsub.f32 %v1062_v35, %v1080_v17 }
 0x634   :  { %v1079_v50 = vpop.xlane.xlu0 %1078  ;;  %v1124_v4 = vpop.permute.xlu1 %1123 }
 0x635   :  { %v1081_v54 = vmul.f32 0.001953125, %v1079_v50  ;;  %v1090_v55 = vmul.f32 %v1082_v47, %v1082_v47  ;;  %v1091_v56 = vmul.f32 %v1083_v25, %v1083_v25  ;;  %v1092_v53 = vmul.f32 %v1084_v48, %v1084_v48 }
 0x636   :  { %v1093_v10 = vmul.f32 %v1085_v51, %v1085_v51 }
 0x637   :  { %v1086_v58 = vsub.f32 %v989_v36, %v1081_v54  ;;  %v1087_v59 = vsub.f32 %v991_v49, %v1081_v54  ;;  %v1098_v60 = vadd.f32 %v1091_v56, %v1090_v55  ;;  %v1088_v61 = vsub.f32 %v1066_v42, %v1081_v54 }
 0x638   :  { %v1089_v62 = vsub.f32 %v1068_v43, %v1081_v54  ;;  %v1140_v39 = vpop.permute.xlu1 %1139  ;;  %v1252_v43 = vld [vmem:[%s1663_s0 + $0x8] sm:$0xff] }
 0x639   :  { %v1099_v12 = vadd.f32 %v1098_v60, %v1092_v53  ;;  %v1094_v31 = vmul.f32 %v1086_v58, %v1086_v58  ;;  %v1095_v63 = vmul.f32 %v1087_v59, %v1087_v59  ;;  %v1096_v18 = vmul.f32 %v1088_v61, %v1088_v61  ;;  %v1255_v53 = vld [vmem:[%s1663_s0 + $0x10] sm:$0xff] }
 0x63a   :  { %v1097_v1 = vmul.f32 %v1089_v62, %v1089_v62 }
 0x63b   :  { %v1100_v0 = vadd.f32 %v1099_v12, %v1093_v10  ;;  %v1103_v22 = vadd.f32 %v1095_v63, %v1094_v31  ;;  %v1258_v12 = vld [vmem:[%s1663_s0 + $0x38] sm:$0xff] }
 0x63c   :  { %v1128_v24 = vpop.permute.xlu0 %1127 }
 0x63d   :  { %1101 = vadd.xlane.f32.xlu1 %v1100_v0  ;;  %v1104_v2 = vadd.f32 %v1103_v22, %v1096_v18 }
 0x63f   :  { %v1105_v32 = vadd.f32 %v1104_v2, %v1097_v1 }
 0x641   :  { %1106 = vadd.xlane.f32.xlu1 %v1105_v32 }
 0x652   :  { %1143 = vperm.xlu1 %1241, %v1596_v11  }
 0x6c6   :  { %v1102_v5 = vpop.xlane.xlu1 %1101 }
 0x6c7   :  { %v1108_v6 = vmul.f32 0.001953125, %v1102_v5 }
 0x6c9   :  { %v1110_v7 = vadd.f32 1e-05, %v1108_v6 }
 0x6ca   :  { %v1107_v8 = vpop.xlane.xlu1 %1106 }
 0x6cb   :  { %1247 = vrsqrt.f32 %v1110_v7  ;;  %v1109_v29 = vmul.f32 0.001953125, %v1107_v8 }
 0x6cd   :  { %v1111_v30 = vadd.f32 1e-05, %v1109_v29 }
 0x6ce   :  { %v1144_v40 = vpop.permute.xlu1 %1143 }
 0x6cf   :  { %1249 = vrsqrt.f32 %v1111_v30 }
 0x6d8   :  { %v1248_v13 = vpop.eup %1247 }
 0x6d9   :  { %v1114_v14 = vmul.f32 %v1248_v13, %v1082_v47  ;;  %v1115_v9 = vmul.f32 %v1248_v13, %v1083_v25  ;;  %v1116_v15 = vmul.f32 %v1248_v13, %v1084_v48  ;;  %v1117_v16 = vmul.f32 %v1248_v13, %v1085_v51 }
 0x6db   :  { %v1130_v19 = vmul.f32 %v1124_v4, %v1114_v14  ;;  %v1131_v20 = vmul.f32 %v1124_v4, %v1115_v9  ;;  %v1132_v21 = vmul.f32 %v1124_v4, %v1116_v15  ;;  %v1133_v23 = vmul.f32 %v1124_v4, %v1117_v16 }
 0x6dc   :  { %v1250_v11 = vpop.eup %1249 }
 0x6dd   :  { %v1118_v26 = vmul.f32 %v1250_v11, %v1086_v58  ;;  %v1119_v57 = vmul.f32 %v1250_v11, %v1087_v59  ;;  %v1120_v27 = vmul.f32 %v1250_v11, %v1088_v61  ;;  %v1121_v28 = vmul.f32 %v1250_v11, %v1089_v62  ;;  %v1256_v59 = vld [vmem:[%s1663_s0 + $0x18] sm:$0xff]  ;;  %v1257_v61 = vld [vmem:[%s1663_s0 + $0x30] sm:$0xff] }
 0x6de   :  { %v1146_v3 = vadd.f32 %v1140_v39, %v1130_v19  ;;  %v1147_v33 = vadd.f32 %v1140_v39, %v1131_v20  ;;  %v1148_v34 = vadd.f32 %v1140_v39, %v1132_v21  ;;  %v1149_v35 = vadd.f32 %v1140_v39, %v1133_v23 }
 0x6df   :  { %v1134_v36 = vmul.f32 %v1128_v24, %v1118_v26  ;;  %v1135_v49 = vmul.f32 %v1128_v24, %v1119_v57  ;;  %v1136_v37 = vmul.f32 %v1128_v24, %v1120_v27  ;;  %v1137_v38 = vmul.f32 %v1128_v24, %v1121_v28 }
 0x6e0   :  { %v1154_v42 = vadd.f32 %v1251_v41, %v1146_v3  ;;  %v1155_v44 = vadd.f32 %v1252_v43, %v1147_v33  ;;  %v1156_v46 = vadd.f32 %v1253_v45, %v1148_v34  ;;  %v1157_v17 = vadd.f32 %v1254_v52, %v1149_v35 }
 0x6e1   :  { %v1150_v47 = vadd.f32 %v1144_v40, %v1134_v36  ;;  %v1151_v25 = vadd.f32 %v1144_v40, %v1135_v49  ;;  %v1152_v48 = vadd.f32 %v1144_v40, %v1136_v37  ;;  %v1153_v50 = vadd.f32 %v1144_v40, %v1137_v38 }
 0x6e2   :  { %v1162_v51 = vmax.f32 %v1154_v42, 0.0  ;;  %v1163_v54 = vmax.f32 %v1155_v44, 0.0  ;;  %v1164_v55 = vmax.f32 %v1156_v46, 0.0  ;;  %v1165_v56 = vmax.f32 %v1157_v17, 0.0 }
 0x6e3   :  { %v1158_v58 = vadd.f32 %v1255_v53, %v1150_v47  ;;  %v1159_v60 = vadd.f32 %v1256_v59, %v1151_v25  ;;  %v1160_v10 = vadd.f32 %v1257_v61, %v1152_v48  ;;  %v1161_v62 = vadd.f32 %v1258_v12, %v1153_v50 }
 0x6e4   :  { %1170 = vst [vmem:[%s1669_s6] sm:$0xff] %v1162_v51  ;;  %1171 = vst [vmem:[%s1669_s6 + $0x8] sm:$0xff] %v1163_v54 }
 0x6e5   :  { %1210 = vst [vmem:[%s1669_s6 + $0x20] sm:$0xff] %v1164_v55  ;;  %1211 = vst [vmem:[%s1669_s6 + $0x28] sm:$0xff] %v1165_v56  ;;  %v1166_v31 = vmax.f32 %v1158_v58, 0.0  ;;  %v1167_v63 = vmax.f32 %v1159_v60, 0.0  ;;  %v1168_v0 = vmax.f32 %v1160_v10, 0.0  ;;  %v1169_v18 = vmax.f32 %v1161_v62, 0.0 }
 0x6e7   :  { %1172 = vst [vmem:[%s1669_s6 + $0x10] sm:$0xff] %v1166_v31  ;;  %1173 = vst [vmem:[%s1669_s6 + $0x18] sm:$0xff] %v1167_v63 }
 0x6e8   :  { %1212 = vst [vmem:[%s1669_s6 + $0x30] sm:$0xff] %v1168_v0  ;;  %1213 = vst [vmem:[%s1669_s6 + $0x38] sm:$0xff] %v1169_v18 }

</bundles_post_ra>
